<compile_context>
chip_gen: v6e
topology: v6e:2x2x1
jax: 0.10.0
libtpu: 0.0.40
codegen_flags: <defaults>
</compile_context>

<pallas_src>
import functools

import jax
import jax.numpy as jnp
from jax import lax
from jax.experimental import pallas as pl
from jax.experimental.pallas import tpu as pltpu

BP = 8  # batch rows padded to the f32 sublane tile (8, 128)


def lstm_classifier_kernel(x_ref, wih_t_ref, whh_t_ref, params_ref,
                           out_ref, xg_sc, *, T, H, O):
    # x_ref      : (T*BP, I)   bf16, time-major rows (row = t*BP + b)
    # wih_t_ref  : (I, 4H)     bf16, pre-transposed (lane-dense)
    # whh_t_ref  : (H, 4H)     bf16, pre-transposed (lane-dense)
    # params_ref : (2 + 2*BP + H, 4H) f32 packed slab:
    #                row 0                : b_ih + b_hh            (lanes [0,4H))
    #                rows 1      : 1+BP   : h0                     (lanes [0,H))
    #                rows 1+BP   : 1+2BP  : c0                     (lanes [0,H))
    #                rows 1+2BP  : 1+2BP+H: W_out^T                (lanes [0,O))
    #                row  1+2BP+H         : b_out                  (lanes [0,O))
    # out_ref    : (BP, O)     f32
    # xg_sc      : (T*BP, 4H)  f32 scratch: hoisted input projection
    H4 = 4 * H
    r_h0 = 1
    r_c0 = r_h0 + BP
    r_wo = r_c0 + BP
    r_bo = r_wo + H

    b_row = params_ref[0:1, :]                 # (1, 4H)
    h0 = params_ref[r_h0:r_c0, 0:H]            # (BP, H)
    c0 = params_ref[r_c0:r_wo, 0:H]            # (BP, H)
    wout_t = params_ref[r_wo:r_bo, 0:O]        # (H, O)
    bout = params_ref[r_bo:r_bo + 1, 0:O]      # (1, O)

    # ---- Phase 1: input projection for ALL timesteps in one MXU matmul
    # (bf16 operands, f32 accumulate) + fused bias add. ----
    xg_sc[...] = (
        jnp.dot(x_ref[...], wih_t_ref[...],
                preferred_element_type=jnp.float32)
        + b_row
    )

    # Recurrent weights held in vregs across the loop (bf16 -> half the
    # footprint of f32).
    # NOTE: pltpu.matmul_push_rhs/matmul_acc_lhs/matmul_pop could hold W_hh
    # resident in the MXU across the recurrence; jnp.dot is kept here for
    # robust lowering across v5e/v6e/v7x at these tiny tile shapes.
    whh_t = whh_t_ref[...]                     # (H, 4H) bf16

    # Per-lane constants for the single-tanh gate activation (precomputed
    # once, outside the serial loop):
    #   i/f/o lanes: sigmoid(x) = 0.5 * tanh(0.5 * x) + 0.5
    #   g lanes    : tanh(x)    = 1.0 * tanh(1.0 * x) + 0.0
    lane = lax.broadcasted_iota(jnp.int32, (BP, H4), 1)
    is_g = (lane >= 2 * H) & (lane < 3 * H)
    scale = jnp.where(is_g, 1.0, 0.5).astype(jnp.float32)   # pre- AND post-mul
    offset = jnp.where(is_g, 0.0, 0.5).astype(jnp.float32)

    # ---- Phase 2: serial recurrence over T.  T is tiny and static, so the
    # loop is fully unrolled in Python: every gate slice below is a static,
    # sublane-aligned (BP, 4H) = (8, 128) vreg load. ----
    # TODO(synk): for large T, switch to a grid axis / lax.fori_loop and
    # chunk xg_sc (v7x VMEM is 64 MiB physical, 32 MiB scoped default).
    h_prev, c_prev = h0, c0
    for t in range(T):
        gates = xg_sc[t * BP:(t + 1) * BP, :] + jnp.dot(
            h_prev.astype(whh_t.dtype), whh_t,
            preferred_element_type=jnp.float32)
        # ONE EUP tanh pass over the whole (BP, 4H) gate block.
        act = jnp.tanh(gates * scale) * scale + offset
        i_g = act[:, 0 * H:1 * H]
        f_g = act[:, 1 * H:2 * H]
        g_g = act[:, 2 * H:3 * H]
        o_g = act[:, 3 * H:4 * H]
        c_prev = f_g * c_prev + i_g * g_g
        h_prev = o_g * jnp.tanh(c_prev)

    # ---- Phase 3: final linear on the last hidden state only. ----
    # (Keep O a multiple of 128 if the head ever grows; fine at O=8.)
    pred = jnp.dot(h_prev, wout_t, preferred_element_type=jnp.float32) + bout
    out_ref[...] = pred.astype(out_ref.dtype)


@jax.jit
def classifier_forward(x, w_ih, w_hh, b_ih, b_hh, h0, c0, w_out, b_out):
    """x: (B, T, I); LSTM weights in PyTorch layout (4H,I)/(4H,H), gate order
    [i,f,g,o]; w_out: (O, H).  Returns (B, O) = linear(lstm(x)[:, -1, :])."""
    B, T, I = x.shape
    H = w_hh.shape[1]
    O = w_out.shape[0]
    H4 = 4 * H

    # Wrapper-side layout plumbing (one-time, tiny at these shapes):
    #  * batch padded to the 8-sublane tile so in-kernel gate slices align,
    #  * time-major flatten so Phase 1 is one lane-dense matmul,
    #  * bf16 operand casts for the MXU (accumulation stays f32 in-kernel).
    # NOTE: at production shapes, avoid the transpose HBM round trip by
    # streaming x batch-major and reading step t with a strided in-kernel
    # slice instead.
    x_p = jnp.pad(x, ((0, BP - B), (0, 0), (0, 0)))
    x_tb = jnp.transpose(x_p, (1, 0, 2)).reshape(T * BP, I)   # row = t*BP + b
    x_tb = x_tb.astype(jnp.bfloat16)
    w_ih_t = w_ih.T.astype(jnp.bfloat16)                      # (I, 4H)
    w_hh_t = w_hh.T.astype(jnp.bfloat16)                      # (H, 4H)

    # Pack every small parameter into one lane-dense f32 slab (width 4H) so
    # the gridless pallas_call issues 4 input DMAs instead of 8.
    def lanes(a):
        return jnp.pad(a, ((0, 0), (0, H4 - a.shape[1])))

    h0_p = jnp.pad(h0, ((0, BP - B), (0, 0)))
    c0_p = jnp.pad(c0, ((0, BP - B), (0, 0)))
    params = jnp.concatenate([
        lanes((b_ih + b_hh).reshape(1, H4)),   # row 0
        lanes(h0_p),                           # rows 1        : 1+BP
        lanes(c0_p),                           # rows 1+BP     : 1+2BP
        lanes(w_out.T),                        # rows 1+2BP    : 1+2BP+H
        lanes(b_out.reshape(1, O)),            # row  1+2BP+H
    ], axis=0).astype(jnp.float32)

    kernel = functools.partial(lstm_classifier_kernel, T=T, H=H, O=O)
    vmem = pl.BlockSpec(memory_space=pltpu.MemorySpace.VMEM)
    out = pl.pallas_call(
        kernel,
        out_shape=jax.ShapeDtypeStruct((BP, O), jnp.float32),
        in_specs=[vmem] * 4,
        out_specs=vmem,
        scratch_shapes=[pltpu.VMEM((T * BP, H4), jnp.float32)],
    )(x_tb, w_ih_t, w_hh_t, params)
    return out[:B]


def reference_forward(x, w_ih, w_hh, b_ih, b_hh, h0, c0, w_out, b_out):
    """Pure-JAX f32 reference (lax.scan LSTM) for correctness checking."""
    H = w_hh.shape[1]
    b = (b_ih + b_hh)[None, :]

    def step(carry, x_t):
        h, c = carry
        gates = x_t @ w_ih.T + h @ w_hh.T + b
        i_g = jax.nn.sigmoid(gates[:, 0 * H:1 * H])
        f_g = jax.nn.sigmoid(gates[:, 1 * H:2 * H])
        g_g = jnp.tanh(gates[:, 2 * H:3 * H])
        o_g = jax.nn.sigmoid(gates[:, 3 * H:4 * H])
        c_new = f_g * c + i_g * g_g
        h_new = o_g * jnp.tanh(c_new)
        return (h_new, c_new), None

    (h_last, _), _ = lax.scan(step, (h0, c0), jnp.transpose(x, (1, 0, 2)))
    return h_last @ w_out.T + b_out[None, :]


if __name__ == "__main__":
    # Small shapes implied by the module: (batch, seq, input_size).
    B, T, I, H, O = 2, 8, 16, 32, 8

    key = jax.random.PRNGKey(0)
    keys = jax.random.split(key, 9)

    # Deterministic parameter init (PyTorch uses U(-1/sqrt(H), 1/sqrt(H))).
    bound = 1.0 / jnp.sqrt(jnp.float32(H))
    w_ih = jax.random.uniform(keys[0], (4 * H, I), jnp.float32, -bound, bound)
    w_hh = jax.random.uniform(keys[1], (4 * H, H), jnp.float32, -bound, bound)
    b_ih = jax.random.uniform(keys[2], (4 * H,), jnp.float32, -bound, bound)
    b_hh = jax.random.uniform(keys[3], (4 * H,), jnp.float32, -bound, bound)
    w_out = jax.random.uniform(keys[4], (O, H), jnp.float32, -bound, bound)
    b_out = jax.random.uniform(keys[5], (O,), jnp.float32, -bound, bound)

    # Inputs and the (random, but deterministic here) initial states.
    x = jax.random.normal(keys[6], (B, T, I), jnp.float32)
    h0 = jax.random.normal(keys[7], (B, H), jnp.float32)
    c0 = jax.random.normal(keys[8], (B, H), jnp.float32)

    pred = classifier_forward(x, w_ih, w_hh, b_ih, b_hh, h0, c0, w_out, b_out)
    pred = jax.block_until_ready(pred)

    ref = reference_forward(x, w_ih, w_hh, b_ih, b_hh, h0, c0, w_out, b_out)
    assert pred.shape == (B, O)
    # bf16 matmul operands (f32 accumulation / gate math) -> ~1e-2 tolerance.
    assert jnp.allclose(pred, ref, atol=3e-2, rtol=3e-2), (
        f"mismatch: max abs err = {jnp.max(jnp.abs(pred - ref))}")

    print("KERNEL_OK")
</pallas_src>

<mosaic_0001>
module attributes {stable_mosaic.version = 11 : i64} {
  func.func @lstm_classifier_kernel(%arg0: memref<64x16xbf16, #tpu.memory_space<vmem>>, %arg1: memref<16x128xbf16, #tpu.memory_space<vmem>>, %arg2: memref<32x128xbf16, #tpu.memory_space<vmem>>, %arg3: memref<50x128xf32, #tpu.memory_space<vmem>>, %arg4: memref<8x8xf32, #tpu.memory_space<vmem>>, %arg5: memref<64x128xf32, #tpu.memory_space<vmem>>) attributes {dimension_semantics = [], scalar_prefetch = 0 : i64, scratch_operands = 1 : i64, tpu.core_type = #tpu.core_type<tc>} {
    %c0 = arith.constant 0 : index
    %c0_0 = arith.constant 0 : index
    %0 = vector.load %arg3[%c0, %c0_0] : memref<50x128xf32, #tpu.memory_space<vmem>>, vector<1x128xf32>
    %c1 = arith.constant 1 : index
    %c0_1 = arith.constant 0 : index
    %1 = vector.load %arg3[%c1, %c0_1] : memref<50x128xf32, #tpu.memory_space<vmem>>, vector<8x32xf32>
    %c9 = arith.constant 9 : index
    %c0_2 = arith.constant 0 : index
    %2 = vector.load %arg3[%c9, %c0_2] : memref<50x128xf32, #tpu.memory_space<vmem>>, vector<8x32xf32>
    %c17 = arith.constant 17 : index
    %c0_3 = arith.constant 0 : index
    %3 = vector.load %arg3[%c17, %c0_3] : memref<50x128xf32, #tpu.memory_space<vmem>>, vector<32x8xf32>
    %c49 = arith.constant 49 : index
    %c0_4 = arith.constant 0 : index
    %4 = vector.load %arg3[%c49, %c0_4] : memref<50x128xf32, #tpu.memory_space<vmem>>, vector<1x8xf32>
    %c0_5 = arith.constant 0 : index
    %c0_6 = arith.constant 0 : index
    %5 = vector.load %arg0[%c0_5, %c0_6] : memref<64x16xbf16, #tpu.memory_space<vmem>>, vector<64x16xbf16>
    %c0_7 = arith.constant 0 : index
    %c0_8 = arith.constant 0 : index
    %6 = vector.load %arg1[%c0_7, %c0_8] : memref<16x128xbf16, #tpu.memory_space<vmem>>, vector<16x128xbf16>
    %cst = arith.constant dense<0.000000e+00> : vector<64x128xf32>
    %7 = tpu.matmul %5, %6, %cst {dimension_numbers = #tpu.dot_dimension_numbers<[1], [0], [0], [1], [0, 0, 1, 1], [], []>} : vector<64x16xbf16>, vector<16x128xbf16>, vector<64x128xf32> -> vector<64x128xf32>
    %8 = vector.broadcast %0 : vector<1x128xf32> to vector<64x128xf32>
    %9 = arith.addf %7, %8 : vector<64x128xf32>
    %c0_9 = arith.constant 0 : index
    %c0_10 = arith.constant 0 : index
    %10 = vector.load %arg5[%c0_9, %c0_10] : memref<64x128xf32, #tpu.memory_space<vmem>>, vector<64x128xf32>
    tpu.vector_store %arg5[%c0_9, %c0_10], %9 {strides = array<i32>} : memref<64x128xf32, #tpu.memory_space<vmem>>, vector<64x128xf32>,
    %c0_11 = arith.constant 0 : index
    %c0_12 = arith.constant 0 : index
    %11 = vector.load %arg2[%c0_11, %c0_12] : memref<32x128xbf16, #tpu.memory_space<vmem>>, vector<32x128xbf16>
    %12 = tpu.iota {dimensions = array<i32: 1>} : vector<8x128xi32>
    %c64_i32 = arith.constant 64 : i32
    %13 = vector.broadcast %c64_i32 : i32 to vector<8x128xi32>
    %14 = arith.cmpi sge, %12, %13 : vector<8x128xi32>
    %c96_i32 = arith.constant 96 : i32
    %15 = vector.broadcast %c96_i32 : i32 to vector<8x128xi32>
    %16 = arith.cmpi slt, %12, %15 : vector<8x128xi32>
    %17 = arith.andi %14, %16 : vector<8x128xi1>
    %cst_13 = arith.constant 1.000000e+00 : f32
    %cst_14 = arith.constant 5.000000e-01 : f32
    %18 = vector.broadcast %cst_13 : f32 to vector<8x128xf32>
    %19 = vector.broadcast %cst_14 : f32 to vector<8x128xf32>
    %20 = arith.select %17, %18, %19 : vector<8x128xi1>, vector<8x128xf32>
    %cst_15 = arith.constant 0.000000e+00 : f32
    %cst_16 = arith.constant 5.000000e-01 : f32
    %21 = vector.broadcast %cst_15 : f32 to vector<8x128xf32>
    %22 = vector.broadcast %cst_16 : f32 to vector<8x128xf32>
    %23 = arith.select %17, %21, %22 : vector<8x128xi1>, vector<8x128xf32>
    %c0_17 = arith.constant 0 : index
    %c0_18 = arith.constant 0 : index
    %24 = vector.load %arg5[%c0_17, %c0_18] : memref<64x128xf32, #tpu.memory_space<vmem>>, vector<8x128xf32>
    %25 = arith.truncf %1 : vector<8x32xf32> to vector<8x32xbf16>
    %cst_19 = arith.constant dense<0.000000e+00> : vector<8x128xf32>
    %26 = tpu.matmul %25, %11, %cst_19 {dimension_numbers = #tpu.dot_dimension_numbers<[1], [0], [0], [1], [0, 0, 1, 1], [], []>} : vector<8x32xbf16>, vector<32x128xbf16>, vector<8x128xf32> -> vector<8x128xf32>
    %27 = arith.addf %24, %26 : vector<8x128xf32>
    %28 = arith.mulf %27, %20 : vector<8x128xf32>
    %29 = math.tanh %28 : vector<8x128xf32>
    %30 = arith.mulf %29, %20 : vector<8x128xf32>
    %31 = arith.addf %30, %23 : vector<8x128xf32>
    %32 = vector.extract_strided_slice %31 {offsets = [0, 0], sizes = [8, 32], strides = [1, 1]} : vector<8x128xf32> to vector<8x32xf32>
    %33 = vector.extract_strided_slice %31 {offsets = [0, 32], sizes = [8, 32], strides = [1, 1]} : vector<8x128xf32> to vector<8x32xf32>
    %34 = vector.extract_strided_slice %31 {offsets = [0, 64], sizes = [8, 32], strides = [1, 1]} : vector<8x128xf32> to vector<8x32xf32>
    %35 = vector.extract_strided_slice %31 {offsets = [0, 96], sizes = [8, 32], strides = [1, 1]} : vector<8x128xf32> to vector<8x32xf32>
    %36 = arith.mulf %33, %2 : vector<8x32xf32>
    %37 = arith.mulf %32, %34 : vector<8x32xf32>
    %38 = arith.addf %36, %37 : vector<8x32xf32>
    %39 = math.tanh %38 : vector<8x32xf32>
    %40 = arith.mulf %35, %39 : vector<8x32xf32>
    %c8 = arith.constant 8 : index
    %c0_20 = arith.constant 0 : index
    %41 = vector.load %arg5[%c8, %c0_20] : memref<64x128xf32, #tpu.memory_space<vmem>>, vector<8x128xf32>
    %42 = arith.truncf %40 : vector<8x32xf32> to vector<8x32xbf16>
    %cst_21 = arith.constant dense<0.000000e+00> : vector<8x128xf32>
    %43 = tpu.matmul %42, %11, %cst_21 {dimension_numbers = #tpu.dot_dimension_numbers<[1], [0], [0], [1], [0, 0, 1, 1], [], []>} : vector<8x32xbf16>, vector<32x128xbf16>, vector<8x128xf32> -> vector<8x128xf32>
    %44 = arith.addf %41, %43 : vector<8x128xf32>
    %45 = arith.mulf %44, %20 : vector<8x128xf32>
    %46 = math.tanh %45 : vector<8x128xf32>
    %47 = arith.mulf %46, %20 : vector<8x128xf32>
    %48 = arith.addf %47, %23 : vector<8x128xf32>
    %49 = vector.extract_strided_slice %48 {offsets = [0, 0], sizes = [8, 32], strides = [1, 1]} : vector<8x128xf32> to vector<8x32xf32>
    %50 = vector.extract_strided_slice %48 {offsets = [0, 32], sizes = [8, 32], strides = [1, 1]} : vector<8x128xf32> to vector<8x32xf32>
    %51 = vector.extract_strided_slice %48 {offsets = [0, 64], sizes = [8, 32], strides = [1, 1]} : vector<8x128xf32> to vector<8x32xf32>
    %52 = vector.extract_strided_slice %48 {offsets = [0, 96], sizes = [8, 32], strides = [1, 1]} : vector<8x128xf32> to vector<8x32xf32>
    %53 = arith.mulf %50, %38 : vector<8x32xf32>
    %54 = arith.mulf %49, %51 : vector<8x32xf32>
    %55 = arith.addf %53, %54 : vector<8x32xf32>
    %56 = math.tanh %55 : vector<8x32xf32>
    %57 = arith.mulf %52, %56 : vector<8x32xf32>
    %c16 = arith.constant 16 : index
    %c0_22 = arith.constant 0 : index
    %58 = vector.load %arg5[%c16, %c0_22] : memref<64x128xf32, #tpu.memory_space<vmem>>, vector<8x128xf32>
    %59 = arith.truncf %57 : vector<8x32xf32> to vector<8x32xbf16>
    %cst_23 = arith.constant dense<0.000000e+00> : vector<8x128xf32>
    %60 = tpu.matmul %59, %11, %cst_23 {dimension_numbers = #tpu.dot_dimension_numbers<[1], [0], [0], [1], [0, 0, 1, 1], [], []>} : vector<8x32xbf16>, vector<32x128xbf16>, vector<8x128xf32> -> vector<8x128xf32>
    %61 = arith.addf %58, %60 : vector<8x128xf32>
    %62 = arith.mulf %61, %20 : vector<8x128xf32>
    %63 = math.tanh %62 : vector<8x128xf32>
    %64 = arith.mulf %63, %20 : vector<8x128xf32>
    %65 = arith.addf %64, %23 : vector<8x128xf32>
    %66 = vector.extract_strided_slice %65 {offsets = [0, 0], sizes = [8, 32], strides = [1, 1]} : vector<8x128xf32> to vector<8x32xf32>
    %67 = vector.extract_strided_slice %65 {offsets = [0, 32], sizes = [8, 32], strides = [1, 1]} : vector<8x128xf32> to vector<8x32xf32>
    %68 = vector.extract_strided_slice %65 {offsets = [0, 64], sizes = [8, 32], strides = [1, 1]} : vector<8x128xf32> to vector<8x32xf32>
    %69 = vector.extract_strided_slice %65 {offsets = [0, 96], sizes = [8, 32], strides = [1, 1]} : vector<8x128xf32> to vector<8x32xf32>
    %70 = arith.mulf %67, %55 : vector<8x32xf32>
    %71 = arith.mulf %66, %68 : vector<8x32xf32>
    %72 = arith.addf %70, %71 : vector<8x32xf32>
    %73 = math.tanh %72 : vector<8x32xf32>
    %74 = arith.mulf %69, %73 : vector<8x32xf32>
    %c24 = arith.constant 24 : index
    %c0_24 = arith.constant 0 : index
    %75 = vector.load %arg5[%c24, %c0_24] : memref<64x128xf32, #tpu.memory_space<vmem>>, vector<8x128xf32>
    %76 = arith.truncf %74 : vector<8x32xf32> to vector<8x32xbf16>
    %cst_25 = arith.constant dense<0.000000e+00> : vector<8x128xf32>
    %77 = tpu.matmul %76, %11, %cst_25 {dimension_numbers = #tpu.dot_dimension_numbers<[1], [0], [0], [1], [0, 0, 1, 1], [], []>} : vector<8x32xbf16>, vector<32x128xbf16>, vector<8x128xf32> -> vector<8x128xf32>
    %78 = arith.addf %75, %77 : vector<8x128xf32>
    %79 = arith.mulf %78, %20 : vector<8x128xf32>
    %80 = math.tanh %79 : vector<8x128xf32>
    %81 = arith.mulf %80, %20 : vector<8x128xf32>
    %82 = arith.addf %81, %23 : vector<8x128xf32>
    %83 = vector.extract_strided_slice %82 {offsets = [0, 0], sizes = [8, 32], strides = [1, 1]} : vector<8x128xf32> to vector<8x32xf32>
    %84 = vector.extract_strided_slice %82 {offsets = [0, 32], sizes = [8, 32], strides = [1, 1]} : vector<8x128xf32> to vector<8x32xf32>
    %85 = vector.extract_strided_slice %82 {offsets = [0, 64], sizes = [8, 32], strides = [1, 1]} : vector<8x128xf32> to vector<8x32xf32>
    %86 = vector.extract_strided_slice %82 {offsets = [0, 96], sizes = [8, 32], strides = [1, 1]} : vector<8x128xf32> to vector<8x32xf32>
    %87 = arith.mulf %84, %72 : vector<8x32xf32>
    %88 = arith.mulf %83, %85 : vector<8x32xf32>
    %89 = arith.addf %87, %88 : vector<8x32xf32>
    %90 = math.tanh %89 : vector<8x32xf32>
    %91 = arith.mulf %86, %90 : vector<8x32xf32>
    %c32 = arith.constant 32 : index
    %c0_26 = arith.constant 0 : index
    %92 = vector.load %arg5[%c32, %c0_26] : memref<64x128xf32, #tpu.memory_space<vmem>>, vector<8x128xf32>
    %93 = arith.truncf %91 : vector<8x32xf32> to vector<8x32xbf16>
    %cst_27 = arith.constant dense<0.000000e+00> : vector<8x128xf32>
    %94 = tpu.matmul %93, %11, %cst_27 {dimension_numbers = #tpu.dot_dimension_numbers<[1], [0], [0], [1], [0, 0, 1, 1], [], []>} : vector<8x32xbf16>, vector<32x128xbf16>, vector<8x128xf32> -> vector<8x128xf32>
    %95 = arith.addf %92, %94 : vector<8x128xf32>
    %96 = arith.mulf %95, %20 : vector<8x128xf32>
    %97 = math.tanh %96 : vector<8x128xf32>
    %98 = arith.mulf %97, %20 : vector<8x128xf32>
    %99 = arith.addf %98, %23 : vector<8x128xf32>
    %100 = vector.extract_strided_slice %99 {offsets = [0, 0], sizes = [8, 32], strides = [1, 1]} : vector<8x128xf32> to vector<8x32xf32>
    %101 = vector.extract_strided_slice %99 {offsets = [0, 32], sizes = [8, 32], strides = [1, 1]} : vector<8x128xf32> to vector<8x32xf32>
    %102 = vector.extract_strided_slice %99 {offsets = [0, 64], sizes = [8, 32], strides = [1, 1]} : vector<8x128xf32> to vector<8x32xf32>
    %103 = vector.extract_strided_slice %99 {offsets = [0, 96], sizes = [8, 32], strides = [1, 1]} : vector<8x128xf32> to vector<8x32xf32>
    %104 = arith.mulf %101, %89 : vector<8x32xf32>
    %105 = arith.mulf %100, %102 : vector<8x32xf32>
    %106 = arith.addf %104, %105 : vector<8x32xf32>
    %107 = math.tanh %106 : vector<8x32xf32>
    %108 = arith.mulf %103, %107 : vector<8x32xf32>
    %c40 = arith.constant 40 : index
    %c0_28 = arith.constant 0 : index
    %109 = vector.load %arg5[%c40, %c0_28] : memref<64x128xf32, #tpu.memory_space<vmem>>, vector<8x128xf32>
    %110 = arith.truncf %108 : vector<8x32xf32> to vector<8x32xbf16>
    %cst_29 = arith.constant dense<0.000000e+00> : vector<8x128xf32>
    %111 = tpu.matmul %110, %11, %cst_29 {dimension_numbers = #tpu.dot_dimension_numbers<[1], [0], [0], [1], [0, 0, 1, 1], [], []>} : vector<8x32xbf16>, vector<32x128xbf16>, vector<8x128xf32> -> vector<8x128xf32>
    %112 = arith.addf %109, %111 : vector<8x128xf32>
    %113 = arith.mulf %112, %20 : vector<8x128xf32>
    %114 = math.tanh %113 : vector<8x128xf32>
    %115 = arith.mulf %114, %20 : vector<8x128xf32>
    %116 = arith.addf %115, %23 : vector<8x128xf32>
    %117 = vector.extract_strided_slice %116 {offsets = [0, 0], sizes = [8, 32], strides = [1, 1]} : vector<8x128xf32> to vector<8x32xf32>
    %118 = vector.extract_strided_slice %116 {offsets = [0, 32], sizes = [8, 32], strides = [1, 1]} : vector<8x128xf32> to vector<8x32xf32>
    %119 = vector.extract_strided_slice %116 {offsets = [0, 64], sizes = [8, 32], strides = [1, 1]} : vector<8x128xf32> to vector<8x32xf32>
    %120 = vector.extract_strided_slice %116 {offsets = [0, 96], sizes = [8, 32], strides = [1, 1]} : vector<8x128xf32> to vector<8x32xf32>
    %121 = arith.mulf %118, %106 : vector<8x32xf32>
    %122 = arith.mulf %117, %119 : vector<8x32xf32>
    %123 = arith.addf %121, %122 : vector<8x32xf32>
    %124 = math.tanh %123 : vector<8x32xf32>
    %125 = arith.mulf %120, %124 : vector<8x32xf32>
    %c48 = arith.constant 48 : index
    %c0_30 = arith.constant 0 : index
    %126 = vector.load %arg5[%c48, %c0_30] : memref<64x128xf32, #tpu.memory_space<vmem>>, vector<8x128xf32>
    %127 = arith.truncf %125 : vector<8x32xf32> to vector<8x32xbf16>
    %cst_31 = arith.constant dense<0.000000e+00> : vector<8x128xf32>
    %128 = tpu.matmul %127, %11, %cst_31 {dimension_numbers = #tpu.dot_dimension_numbers<[1], [0], [0], [1], [0, 0, 1, 1], [], []>} : vector<8x32xbf16>, vector<32x128xbf16>, vector<8x128xf32> -> vector<8x128xf32>
    %129 = arith.addf %126, %128 : vector<8x128xf32>
    %130 = arith.mulf %129, %20 : vector<8x128xf32>
    %131 = math.tanh %130 : vector<8x128xf32>
    %132 = arith.mulf %131, %20 : vector<8x128xf32>
    %133 = arith.addf %132, %23 : vector<8x128xf32>
    %134 = vector.extract_strided_slice %133 {offsets = [0, 0], sizes = [8, 32], strides = [1, 1]} : vector<8x128xf32> to vector<8x32xf32>
    %135 = vector.extract_strided_slice %133 {offsets = [0, 32], sizes = [8, 32], strides = [1, 1]} : vector<8x128xf32> to vector<8x32xf32>
    %136 = vector.extract_strided_slice %133 {offsets = [0, 64], sizes = [8, 32], strides = [1, 1]} : vector<8x128xf32> to vector<8x32xf32>
    %137 = vector.extract_strided_slice %133 {offsets = [0, 96], sizes = [8, 32], strides = [1, 1]} : vector<8x128xf32> to vector<8x32xf32>
    %138 = arith.mulf %135, %123 : vector<8x32xf32>
    %139 = arith.mulf %134, %136 : vector<8x32xf32>
    %140 = arith.addf %138, %139 : vector<8x32xf32>
    %141 = math.tanh %140 : vector<8x32xf32>
    %142 = arith.mulf %137, %141 : vector<8x32xf32>
    %c56 = arith.constant 56 : index
    %c0_32 = arith.constant 0 : index
    %143 = vector.load %arg5[%c56, %c0_32] : memref<64x128xf32, #tpu.memory_space<vmem>>, vector<8x128xf32>
    %144 = arith.truncf %142 : vector<8x32xf32> to vector<8x32xbf16>
    %cst_33 = arith.constant dense<0.000000e+00> : vector<8x128xf32>
    %145 = tpu.matmul %144, %11, %cst_33 {dimension_numbers = #tpu.dot_dimension_numbers<[1], [0], [0], [1], [0, 0, 1, 1], [], []>} : vector<8x32xbf16>, vector<32x128xbf16>, vector<8x128xf32> -> vector<8x128xf32>
    %146 = arith.addf %143, %145 : vector<8x128xf32>
    %147 = arith.mulf %146, %20 : vector<8x128xf32>
    %148 = math.tanh %147 : vector<8x128xf32>
    %149 = arith.mulf %148, %20 : vector<8x128xf32>
    %150 = arith.addf %149, %23 : vector<8x128xf32>
    %151 = vector.extract_strided_slice %150 {offsets = [0, 0], sizes = [8, 32], strides = [1, 1]} : vector<8x128xf32> to vector<8x32xf32>
    %152 = vector.extract_strided_slice %150 {offsets = [0, 32], sizes = [8, 32], strides = [1, 1]} : vector<8x128xf32> to vector<8x32xf32>
    %153 = vector.extract_strided_slice %150 {offsets = [0, 64], sizes = [8, 32], strides = [1, 1]} : vector<8x128xf32> to vector<8x32xf32>
    %154 = vector.extract_strided_slice %150 {offsets = [0, 96], sizes = [8, 32], strides = [1, 1]} : vector<8x128xf32> to vector<8x32xf32>
    %155 = arith.mulf %152, %140 : vector<8x32xf32>
    %156 = arith.mulf %151, %153 : vector<8x32xf32>
    %157 = arith.addf %155, %156 : vector<8x32xf32>
    %158 = math.tanh %157 : vector<8x32xf32>
    %159 = arith.mulf %154, %158 : vector<8x32xf32>
    %cst_34 = arith.constant dense<0.000000e+00> : vector<8x8xf32>
    %160 = tpu.matmul %159, %3, %cst_34 {dimension_numbers = #tpu.dot_dimension_numbers<[1], [0], [0], [1], [0, 0, 1, 1], [], []>} : vector<8x32xf32>, vector<32x8xf32>, vector<8x8xf32> -> vector<8x8xf32>
    %161 = vector.broadcast %4 : vector<1x8xf32> to vector<8x8xf32>
    %162 = arith.addf %160, %161 : vector<8x8xf32>
    %c0_35 = arith.constant 0 : index
    %c0_36 = arith.constant 0 : index
    %163 = vector.load %arg4[%c0_35, %c0_36] : memref<8x8xf32, #tpu.memory_space<vmem>>, vector<8x8xf32>
    tpu.vector_store %arg4[%c0_35, %c0_36], %162 {strides = array<i32>} : memref<8x8xf32, #tpu.memory_space<vmem>>, vector<8x8xf32>,
    return
  }
}

</mosaic_0001>

<bundles_post_ra>
// kernel: classifier_forward.1
= control target key start
LH: loop header
LB: loop body
LE: loop exit
PB: predicated region body
PF: predicated region fallthrough
CT: control target
= control target key end

     0   :  { %v1007_v0 = vmov 0.0   ;;  %vm1008_vm0 = vmmov 0   ;;  %vm66_vm1 = vcmask 130048   ;;  %vm177_vm2 = vcmask 261120   ;;  %s1010_s27 = smov 64   ;;  %s1011_s30 = smov 32   ;;  %s1245_s1 = inlined_call_operand.vmem [shape: bf16[16,128], index: 1, kind: input, shape index: {}]   ;;  %s1246_s2 = inlined_call_operand.vmem [shape: bf16[32,128], index: 2, kind: input, shape index: {}]   ;;  %s1247_s0 = inlined_call_operand.vmem [shape: bf16[64,16], index: 0, kind: input, shape index: {}]   ;;  %s1248_s3 = inlined_call_operand.vmem [shape: f32[50,128], index: 3, kind: input, shape index: {}]   ;;  %s1249_s4 = inlined_call_operand.vmem [shape: f32[8,8], index: 4, kind: output, shape index: {}]  }
   0x1   :  { %888 = vmatprep.subr.bf16.mxu1 %v1007_v0  ;;  %v968_v1 = vld [vmem:[%s1245_s1] sm:$0xff]   ;;  %892 = vmatprep.mubr.msk.bf16.mxu1 %vm1008_vm0, %v1007_v0  ;;  %v1046_v2 = vld [vmem:[%s1246_s2 + $0x8] sm:$0xff]   ;;  %v156_v8 = vlaneseq  ;;  %v1009_v14 = vmov 0.5   ;;  %v973_v55 = vld [vmem:[%s1247_s0 + $0x10] sm:$0xff]   ;;  %vm816_vm6 = vcmask 64512  }
   0x2   :  { %878 = vmatprep.subr.bf16.mxu0 %v968_v1  ;;  %v970_v3 = vld [vmem:[%s1247_s0] sm:$0xff]   ;;  %889 = vmatpush3.bf16.msra.mxu1 %v1046_v2  ;;  %v971_v4 = vld [vmem:[%s1247_s0 + $0x8] sm:$0xff]   ;;  %v974_v56 = vld [vmem:[%s1247_s0 + $0x18] sm:$0xff]  }
   0x3   :  { %879 = vmatpush3.bf16.msra.mxu0 %v968_v1  ;;  %880 = vmatprep.mubr.msk.bf16.mxu0 %vm66_vm1, %v970_v3  ;;  %v1060_v5 = vld [vmem:[%s1246_s2] sm:$0xff]   ;;  %v157_v9 = vand.u32 127, %v156_v8  ;;  %v20_v26 = vld [vmem:[%s1248_s3 + $0x9] sm:$0xff] }
   0x4   :  { %890 = vmatprep.subr.bf16.mxu1 %v1007_v0  ;;  %v19_v6 = vld [vmem:[%s1248_s3 + $0x1] sm:$0xff]  ;;  %904 = vmatprep.subr.bf16.mxu0 %v1007_v0  ;;  %v1085_v11 = vld [vmem:[%s1248_s3] ss:$0 sm:$0xff] }
   0x5   :  { %v164_v7 = vpack.c.bf16 %v19_v6, %v19_v6  ;;  %vm158_vm3 = vcmp.ge.s32.totalorder %v157_v9, 64  ;;  %vm159_vm4 = vcmp.lt.s32.totalorder %v157_v9, 96 }
   0x6   :  { %881 = vmatmul.mubr.msk.bf16.vlgmr.msra.gmra.mxu0 %vm66_vm1, %v971_v4  ;;  %891 = vmatpush3.bf16.msra.mxu1 %v1060_v5  ;;  %vm160_vm5 = vmand %vm158_vm3, %vm159_vm4 }
   0x7   :  { %905 = vmatpush3.bf16.msra.mxu0 %v1046_v2  ;;  %896 = vmatprep.subr.bf16.mxu1 %v1007_v0  ;;  %v1088_v15 = vsel %vm160_vm5, 1.0, %v1009_v14  ;;  %v1091_v23 = vsel %vm160_vm5, 0.0, %v1009_v14 }
   0x8   :  { %906 = vmatprep.subr.bf16.mxu0 %v1007_v0  ;;  %884 = vmatprep.mubr.msk.bf16.mxu0 %vm66_vm1, %v973_v55 }
   0x9   :  { %893 = vmatmul.mubr.msk.bf16.vlgmr.msra.gmra.mxu1 %vm177_vm2, %v164_v7 }
   0xa   :  { %897 = vmatpush3.bf16.msra.mxu1 %v1046_v2  ;;  %900 = vmatprep.mubr.msk.bf16.mxu1 %vm1008_vm0, %v1007_v0 }
   0xb   :  { %898 = vmatprep.subr.bf16.mxu1 %v1007_v0  ;;  %907 = vmatpush3.bf16.msra.mxu0 %v1060_v5 }
   0xc   :  { %920 = vmatprep.subr.bf16.mxu0 %v1007_v0 }
   0xe   :  { %899 = vmatpush3.bf16.msra.mxu1 %v1060_v5  ;;  %885 = vmatmul.mubr.msk.bf16.gmra.mxu0 %vm66_vm1, %v974_v56 }
   0xf   :  { %912 = vmatprep.subr.bf16.mxu1 %v1007_v0  ;;  %908 = vmatprep.mubr.msk.bf16.mxu0 %vm1008_vm0, %v1007_v0 }
  0xc6   :  { %v1080_v10 = vpop.f32.mrf.mxu0 }
  0xc7   :  { %v122_v4 = vadd.f32 %v1080_v10, %v1085_v11 }
  0xc8   :  { %v113_v12 = vpop.f32.mrf.mxu0 }
  0xc9   :  { %v114_v13 = vadd.f32 %v1085_v11, %v113_v12  ;;  %v215_v16 = vpop.f32.mrf.mxu1 }
  0xca   :  { %v1110_v38 = vpop.f32.mrf.mxu0 }
  0xcb   :  { %v221_v17 = vadd.f32 %v215_v16, %v114_v13  ;;  %v894_v18 = vpop.f32.mrf.mxu1 }
  0xcc   :  { %v116_v39 = vpop.f32.mrf.mxu0 }
  0xcd   :  { %v222_v19 = vmul.f32 %v221_v17, %v1088_v15  ;;  %v218_v20 = vpop.f32.mrf.mxu1  ;;  %v117_v40 = vadd.f32 %v1085_v11, %v116_v39 }
  0xce   :  { %v1137_v62 = vpop.f32.mrf.mxu0 }
  0xcf   :  { %975 = vtanh.f32 %v222_v19  ;;  %v895_v21 = vpop.f32.mrf.mxu1 }
  0xd0   :  { %v1139_v63 = vpop.f32.mrf.mxu0 }
  0xd2   :  { %v1141_v1 = vpop.f32.mrf.mxu0 }
  0xd4   :  { %v1143_v3 = vpop.f32.mrf.mxu0 }
  0xdc   :  { %v976_v22 = vpop.eup %975 }
  0xdd   :  { %v224_v24 = vmul.f32 %v976_v22, %v1088_v15 }
  0xdf   :  { %v225_v25 = vadd.f32 %v224_v24, %v1091_v23 }
  0xe1   :  { %232 = vrot.lane.b32.xlu0 %v225_v25, %s1010_s27 }
  0xe5   :  { %227 = vrot.lane.b32.xlu0 %v20_v26, %s1011_s30 }
 0x153   :  { %v233_v27 = vpop.permute.xlu0 %232 }
 0x154   :  { %v235_v28 = vmul.f32 %v233_v27, %v225_v25 }
 0x156   :  { %237 = vrot.lane.b32.xlu1 %v235_v28, %s1011_s30  ;;  %v125_v28 = vadd.f32 %v1110_v38, %v1085_v11 }
 0x157   :  { %v228_v29 = vpop.permute.xlu0 %227 }
 0x158   :  { %v230_v30 = vmul.f32 %v228_v29, %v225_v25 }
 0x1c8   :  { %v238_v31 = vpop.permute.xlu1 %237 }
 0x1c9   :  { %v240_v32 = vadd.f32 %v238_v31, %v230_v30 }
 0x1cb   :  { %977 = vtanh.f32 %v240_v32 }
 0x1d8   :  { %v978_v33 = vpop.eup %977 }
 0x1d9   :  { %243 = vrot.lane.b32.xlu1 %v978_v33, %s1010_s27 }
 0x24b   :  { %v244_v34 = vpop.permute.xlu1 %243 }
 0x24c   :  { %v246_v35 = vmul.f32 %v244_v34, %v225_v25 }
 0x24e   :  { %v248_v36 = vpack.c.bf16 %v246_v35, %v246_v35 }
 0x250   :  { %250 = vrot.lane.b32.xlu0 %v248_v36, %s1011_s30 }
 0x2c2   :  { %v251_v37 = vpop.permute.xlu0 %250 }
 0x2c3   :  { %901 = vmatmul.mubr.msk.bf16.vlgmr.msra.gmra.mxu1 %vm177_vm2, %v251_v37 }
 0x2c4   :  { %913 = vmatpush3.bf16.msra.mxu1 %v1046_v2  ;;  %916 = vmatprep.mubr.msk.bf16.mxu1 %vm1008_vm0, %v1007_v0 }
 0x2c5   :  { %914 = vmatprep.subr.bf16.mxu1 %v1007_v0 }
 0x2c8   :  { %915 = vmatpush3.bf16.msra.mxu1 %v1060_v5 }
 0x2c9   :  { %928 = vmatprep.subr.bf16.mxu1 %v1007_v0 }
 0x383   :  { %v289_v41 = vpop.f32.mrf.mxu1 }
 0x384   :  { %v295_v42 = vadd.f32 %v289_v41, %v117_v40 }
 0x385   :  { %v902_v43 = vpop.f32.mrf.mxu1 }
 0x386   :  { %v296_v44 = vmul.f32 %v295_v42, %v1088_v15 }
 0x387   :  { %v292_v45 = vpop.f32.mrf.mxu1 }
 0x388   :  { %979 = vtanh.f32 %v296_v44 }
 0x389   :  { %v903_v46 = vpop.f32.mrf.mxu1 }
 0x395   :  { %v980_v47 = vpop.eup %979 }
 0x396   :  { %v298_v48 = vmul.f32 %v980_v47, %v1088_v15 }
 0x398   :  { %v299_v49 = vadd.f32 %v298_v48, %v1091_v23  ;;  %v130_v48 = vadd.f32 %v1085_v11, %v1139_v63 }
 0x39a   :  { %302 = vrot.lane.b32.xlu1 %v299_v49, %s1010_s27  ;;  %v300_v52 = vmul.f32 %v299_v49, %v240_v32 }
 0x40c   :  { %v303_v50 = vpop.permute.xlu1 %302 }
 0x40d   :  { %v305_v51 = vmul.f32 %v303_v50, %v299_v49 }
 0x40f   :  { %307 = vrot.lane.b32.xlu0 %v305_v51, %s1011_s30 }
 0x481   :  { %v308_v53 = vpop.permute.xlu0 %307 }
 0x482   :  { %v310_v54 = vadd.f32 %v308_v53, %v300_v52 }
 0x484   :  { %981 = vtanh.f32 %v310_v54 }
 0x491   :  { %v982_v57 = vpop.eup %981 }
 0x492   :  { %313 = vrot.lane.b32.xlu1 %v982_v57, %s1010_s27 }
 0x504   :  { %v314_v58 = vpop.permute.xlu1 %313 }
 0x505   :  { %v316_v59 = vmul.f32 %v314_v58, %v299_v49 }
 0x507   :  { %v318_v60 = vpack.c.bf16 %v316_v59, %v316_v59 }
 0x509   :  { %320 = vrot.lane.b32.xlu0 %v318_v60, %s1011_s30 }
 0x57b   :  { %v321_v61 = vpop.permute.xlu0 %320 }
 0x57c   :  { %909 = vmatmul.mubr.msk.bf16.vlgmr.msra.gmra.mxu0 %vm177_vm2, %v321_v61 }
 0x57d   :  { %921 = vmatpush3.bf16.msra.mxu0 %v1046_v2  ;;  %924 = vmatprep.mubr.msk.bf16.mxu0 %vm1008_vm0, %v1007_v0 }
 0x57e   :  { %922 = vmatprep.subr.bf16.mxu0 %v1007_v0 }
 0x581   :  { %923 = vmatpush3.bf16.msra.mxu0 %v1060_v5 }
 0x582   :  { %936 = vmatprep.subr.bf16.mxu0 %v1007_v0 }
 0x63c   :  { %v359_v6 = vpop.f32.mrf.mxu0 }
 0x63d   :  { %v365_v7 = vadd.f32 %v359_v6, %v122_v4 }
 0x63e   :  { %v910_v8 = vpop.f32.mrf.mxu0 }
 0x63f   :  { %v366_v9 = vmul.f32 %v365_v7, %v1088_v15 }
 0x640   :  { %v362_v12 = vpop.f32.mrf.mxu0 }
 0x641   :  { %983 = vtanh.f32 %v366_v9  ;;  %v133_v12 = vadd.f32 %v1085_v11, %v1143_v3 }
 0x642   :  { %v911_v13 = vpop.f32.mrf.mxu0 }
 0x64e   :  { %v984_v14 = vpop.eup %983 }
 0x64f   :  { %v368_v16 = vmul.f32 %v984_v14, %v1088_v15 }
 0x651   :  { %v369_v17 = vadd.f32 %v368_v16, %v1091_v23 }
 0x653   :  { %372 = vrot.lane.b32.xlu1 %v369_v17, %s1010_s27  ;;  %v370_v10 = vmul.f32 %v369_v17, %v310_v54 }
 0x6c5   :  { %v373_v18 = vpop.permute.xlu1 %372 }
 0x6c6   :  { %v375_v19 = vmul.f32 %v373_v18, %v369_v17 }
 0x6c8   :  { %377 = vrot.lane.b32.xlu0 %v375_v19, %s1011_s30 }
 0x73a   :  { %v378_v20 = vpop.permute.xlu0 %377 }
 0x73b   :  { %v380_v21 = vadd.f32 %v378_v20, %v370_v10 }
 0x73d   :  { %985 = vtanh.f32 %v380_v21 }
 0x74a   :  { %v986_v22 = vpop.eup %985 }
 0x74b   :  { %383 = vrot.lane.b32.xlu1 %v986_v22, %s1010_s27 }
 0x7bd   :  { %v384_v24 = vpop.permute.xlu1 %383 }
 0x7be   :  { %v386_v25 = vmul.f32 %v384_v24, %v369_v17 }
 0x7c0   :  { %v388_v26 = vpack.c.bf16 %v386_v25, %v386_v25 }
 0x7c2   :  { %390 = vrot.lane.b32.xlu0 %v388_v26, %s1011_s30 }
 0x834   :  { %v391_v27 = vpop.permute.xlu0 %390 }
 0x835   :  { %917 = vmatmul.mubr.msk.bf16.vlgmr.msra.gmra.mxu1 %vm177_vm2, %v391_v27 }
 0x836   :  { %929 = vmatpush3.bf16.msra.mxu1 %v1046_v2  ;;  %932 = vmatprep.mubr.msk.bf16.mxu1 %vm1008_vm0, %v1007_v0 }
 0x837   :  { %930 = vmatprep.subr.bf16.mxu1 %v1007_v0 }
 0x83a   :  { %931 = vmatpush3.bf16.msra.mxu1 %v1060_v5 }
 0x83b   :  { %944 = vmatprep.subr.bf16.mxu1 %v1007_v0 }
 0x8f5   :  { %v429_v29 = vpop.f32.mrf.mxu1 }
 0x8f6   :  { %v435_v30 = vadd.f32 %v429_v29, %v125_v28 }
 0x8f7   :  { %v918_v31 = vpop.f32.mrf.mxu1 }
 0x8f8   :  { %v436_v32 = vmul.f32 %v435_v30, %v1088_v15  ;;  %v138_v30 = vadd.f32 %v1137_v62, %v1085_v11 }
 0x8f9   :  { %v432_v33 = vpop.f32.mrf.mxu1 }
 0x8fa   :  { %987 = vtanh.f32 %v436_v32 }
 0x8fb   :  { %v919_v34 = vpop.f32.mrf.mxu1 }
 0x907   :  { %v988_v35 = vpop.eup %987 }
 0x908   :  { %v438_v36 = vmul.f32 %v988_v35, %v1088_v15 }
 0x90a   :  { %v439_v37 = vadd.f32 %v438_v36, %v1091_v23 }
 0x90c   :  { %442 = vrot.lane.b32.xlu1 %v439_v37, %s1010_s27  ;;  %v440_v38 = vmul.f32 %v439_v37, %v380_v21 }
 0x97e   :  { %v443_v39 = vpop.permute.xlu1 %442 }
 0x97f   :  { %v445_v40 = vmul.f32 %v443_v39, %v439_v37 }
 0x981   :  { %447 = vrot.lane.b32.xlu0 %v445_v40, %s1011_s30 }
 0x9f3   :  { %v448_v41 = vpop.permute.xlu0 %447 }
 0x9f4   :  { %v450_v42 = vadd.f32 %v448_v41, %v440_v38 }
 0x9f6   :  { %989 = vtanh.f32 %v450_v42 }
 0xa03   :  { %v990_v43 = vpop.eup %989 }
 0xa04   :  { %453 = vrot.lane.b32.xlu1 %v990_v43, %s1010_s27 }
 0xa76   :  { %v454_v44 = vpop.permute.xlu1 %453 }
 0xa77   :  { %v456_v45 = vmul.f32 %v454_v44, %v439_v37 }
 0xa79   :  { %v458_v46 = vpack.c.bf16 %v456_v45, %v456_v45 }
 0xa7b   :  { %460 = vrot.lane.b32.xlu0 %v458_v46, %s1011_s30 }
 0xaed   :  { %v461_v47 = vpop.permute.xlu0 %460 }
 0xaee   :  { %925 = vmatmul.mubr.msk.bf16.vlgmr.msra.gmra.mxu0 %vm177_vm2, %v461_v47 }
 0xaef   :  { %937 = vmatpush3.bf16.msra.mxu0 %v1046_v2  ;;  %940 = vmatprep.mubr.msk.bf16.mxu0 %vm1008_vm0, %v1007_v0 }
 0xaf0   :  { %938 = vmatprep.subr.bf16.mxu0 %v1007_v0 }
 0xaf3   :  { %939 = vmatpush3.bf16.msra.mxu0 %v1060_v5 }
 0xaf4   :  { %952 = vmatprep.subr.mxu0 %v1007_v0 }
 0xbae   :  { %v499_v49 = vpop.f32.mrf.mxu0 }
 0xbaf   :  { %v505_v50 = vadd.f32 %v499_v49, %v130_v48  ;;  %v141_v49 = vadd.f32 %v1141_v1, %v1085_v11 }
 0xbb0   :  { %v926_v51 = vpop.f32.mrf.mxu0 }
 0xbb1   :  { %v506_v52 = vmul.f32 %v505_v50, %v1088_v15 }
 0xbb2   :  { %v502_v53 = vpop.f32.mrf.mxu0 }
 0xbb3   :  { %991 = vtanh.f32 %v506_v52 }
 0xbb4   :  { %v927_v54 = vpop.f32.mrf.mxu0 }
 0xbc0   :  { %v992_v55 = vpop.eup %991 }
 0xbc1   :  { %v508_v56 = vmul.f32 %v992_v55, %v1088_v15 }
 0xbc3   :  { %v509_v57 = vadd.f32 %v508_v56, %v1091_v23 }
 0xbc5   :  { %512 = vrot.lane.b32.xlu1 %v509_v57, %s1010_s27  ;;  %v510_v60 = vmul.f32 %v509_v57, %v450_v42 }
 0xc37   :  { %v513_v58 = vpop.permute.xlu1 %512 }
 0xc38   :  { %v515_v59 = vmul.f32 %v513_v58, %v509_v57 }
 0xc3a   :  { %517 = vrot.lane.b32.xlu0 %v515_v59, %s1011_s30 }
 0xcac   :  { %v518_v61 = vpop.permute.xlu0 %517 }
 0xcad   :  { %v520_v63 = vadd.f32 %v518_v61, %v510_v60 }
 0xcaf   :  { %993 = vtanh.f32 %v520_v63 }
 0xcbc   :  { %v994_v4 = vpop.eup %993 }
 0xcbd   :  { %523 = vrot.lane.b32.xlu1 %v994_v4, %s1010_s27  ;;  %v21_v4 = vld [vmem:[%s1248_s3 + $0x11] sm:$0xff] }
 0xd2f   :  { %v524_v6 = vpop.permute.xlu1 %523 }
 0xd30   :  { %v526_v7 = vmul.f32 %v524_v6, %v509_v57 }
 0xd32   :  { %v528_v8 = vpack.c.bf16 %v526_v7, %v526_v7 }
 0xd34   :  { %530 = vrot.lane.b32.xlu0 %v528_v8, %s1011_s30 }
 0xda6   :  { %v531_v9 = vpop.permute.xlu0 %530 }
 0xda7   :  { %933 = vmatmul.mubr.msk.bf16.vlgmr.msra.gmra.mxu1 %vm177_vm2, %v531_v9 }
 0xda8   :  { %945 = vmatpush3.bf16.msra.mxu1 %v1046_v2  ;;  %948 = vmatprep.mubr.msk.bf16.mxu1 %vm1008_vm0, %v1007_v0 }
 0xda9   :  { %946 = vmatprep.subr.bf16.mxu1 %v1007_v0 }
 0xdac   :  { %947 = vmatpush3.bf16.msra.mxu1 %v1060_v5 }
 0xe67   :  { %v569_v13 = vpop.f32.mrf.mxu1 }
 0xe68   :  { %v575_v14 = vadd.f32 %v569_v13, %v133_v12  ;;  %v842_v12 = vld [vmem:[%s1248_s3 + $0x31] ss:$0 sm:$0xff] }
 0xe69   :  { %v934_v16 = vpop.f32.mrf.mxu1 }
 0xe6a   :  { %v576_v17 = vmul.f32 %v575_v14, %v1088_v15 }
 0xe6b   :  { %v572_v18 = vpop.f32.mrf.mxu1 }
 0xe6c   :  { %995 = vtanh.f32 %v576_v17 }
 0xe6d   :  { %v935_v19 = vpop.f32.mrf.mxu1 }
 0xe79   :  { %v996_v10 = vpop.eup %995 }
 0xe7a   :  { %v578_v2 = vmul.f32 %v996_v10, %v1088_v15 }
 0xe7c   :  { %v579_v20 = vadd.f32 %v578_v2, %v1091_v23 }
 0xe7e   :  { %582 = vrot.lane.b32.xlu1 %v579_v20, %s1010_s27  ;;  %v580_v3 = vmul.f32 %v579_v20, %v520_v63  ;;  %v24_v63 = vld [vmem:[%s1248_s3 + $0x29] sm:$0xff] }
 0xef0   :  { %v583_v21 = vpop.permute.xlu1 %582 }
 0xef1   :  { %v585_v5 = vmul.f32 %v583_v21, %v579_v20 }
 0xef3   :  { %587 = vrot.lane.b32.xlu0 %v585_v5, %s1011_s30 }
 0xf65   :  { %v588_v22 = vpop.permute.xlu0 %587 }
 0xf66   :  { %v590_v24 = vadd.f32 %v588_v22, %v580_v3 }
 0xf68   :  { %997 = vtanh.f32 %v590_v24 }
 0xf75   :  { %v998_v25 = vpop.eup %997 }
 0xf76   :  { %593 = vrot.lane.b32.xlu1 %v998_v25, %s1010_s27 }
 0xfe8   :  { %v594_v26 = vpop.permute.xlu1 %593 }
 0xfe9   :  { %v596_v27 = vmul.f32 %v594_v26, %v579_v20 }
 0xfeb   :  { %v598_v28 = vpack.c.bf16 %v596_v27, %v596_v27 }
 0xfed   :  { %600 = vrot.lane.b32.xlu0 %v598_v28, %s1011_s30 }
0x105f   :  { %v601_v29 = vpop.permute.xlu0 %600 }
0x1060   :  { %941 = vmatmul.mubr.msk.bf16.vlgmr.msra.gmra.mxu0 %vm177_vm2, %v601_v29 }
0x1061   :  { %960 = vmatprep.mubr.msk.f32.mxu0 %vm1008_vm0, %v1007_v0  ;;  %953 = vmatpush3.msra.mxu0 %v24_v63 }
0x1062   :  { %954 = vmatprep.subr.mxu0 %v1007_v0 }
0x1120   :  { %v639_v31 = vpop.f32.mrf.mxu0 }
0x1121   :  { %v645_v32 = vadd.f32 %v639_v31, %v138_v30 }
0x1122   :  { %v942_v33 = vpop.f32.mrf.mxu0 }
0x1123   :  { %v646_v34 = vmul.f32 %v645_v32, %v1088_v15 }
0x1124   :  { %v642_v35 = vpop.f32.mrf.mxu0 }
0x1125   :  { %999 = vtanh.f32 %v646_v34 }
0x1126   :  { %v943_v36 = vpop.f32.mrf.mxu0 }
0x1132   :  { %v1000_v37 = vpop.eup %999 }
0x1133   :  { %v648_v39 = vmul.f32 %v1000_v37, %v1088_v15 }
0x1135   :  { %v649_v40 = vadd.f32 %v648_v39, %v1091_v23 }
0x1137   :  { %652 = vrot.lane.b32.xlu1 %v649_v40, %s1010_s27  ;;  %v650_v62 = vmul.f32 %v649_v40, %v590_v24 }
0x11a9   :  { %v653_v38 = vpop.permute.xlu1 %652 }
0x11aa   :  { %v655_v41 = vmul.f32 %v653_v38, %v649_v40 }
0x11ac   :  { %657 = vrot.lane.b32.xlu0 %v655_v41, %s1011_s30 }
0x121e   :  { %v658_v42 = vpop.permute.xlu0 %657 }
0x121f   :  { %v660_v43 = vadd.f32 %v658_v42, %v650_v62 }
0x1221   :  { %1001 = vtanh.f32 %v660_v43 }
0x122e   :  { %v1002_v44 = vpop.eup %1001 }
0x122f   :  { %663 = vrot.lane.b32.xlu1 %v1002_v44, %s1010_s27 }
0x12a1   :  { %v664_v45 = vpop.permute.xlu1 %663 }
0x12a2   :  { %v666_v46 = vmul.f32 %v664_v45, %v649_v40 }
0x12a4   :  { %v668_v47 = vpack.c.bf16 %v666_v46, %v666_v46 }
0x12a6   :  { %670 = vrot.lane.b32.xlu0 %v668_v47, %s1011_s30 }
0x1318   :  { %v671_v48 = vpop.permute.xlu0 %670 }
0x1319   :  { %949 = vmatmul.mubr.msk.bf16.vlgmr.msra.gmra.mxu1 %vm177_vm2, %v671_v48 }
0x13d9   :  { %v709_v50 = vpop.f32.mrf.mxu1 }
0x13da   :  { %v715_v51 = vadd.f32 %v709_v50, %v141_v49 }
0x13db   :  { %v950_v52 = vpop.f32.mrf.mxu1 }
0x13dc   :  { %v716_v53 = vmul.f32 %v715_v51, %v1088_v15 }
0x13dd   :  { %v712_v54 = vpop.f32.mrf.mxu1 }
0x13de   :  { %1003 = vtanh.f32 %v716_v53 }
0x13df   :  { %v951_v55 = vpop.f32.mrf.mxu1 }
0x13eb   :  { %v1004_v56 = vpop.eup %1003 }
0x13ec   :  { %v718_v57 = vmul.f32 %v1004_v56, %v1088_v15  ;;  %v23_v15 = vld [vmem:[%s1248_s3 + $0x21] sm:$0xff] }
0x13ed   :  { %955 = vmatpush3.msra.mxu0 %v23_v15 }
0x13ee   :  { %v719_v58 = vadd.f32 %v718_v57, %v1091_v23  ;;  %v22_v23 = vld [vmem:[%s1248_s3 + $0x19] sm:$0xff]  ;;  %956 = vmatprep.subr.mxu0 %v1007_v0 }
0x13ef   :  { %957 = vmatpush3.msra.mxu0 %v22_v23 }
0x13f0   :  { %722 = vrot.lane.b32.xlu1 %v719_v58, %s1010_s27  ;;  %v720_v11 = vmul.f32 %v719_v58, %v660_v43  ;;  %958 = vmatprep.subr.mxu0 %v1007_v0 }
0x13f1   :  { %959 = vmatpush3.msra.mxu0 %v21_v4 }
0x1462   :  { %v723_v59 = vpop.permute.xlu1 %722 }
0x1463   :  { %v725_v60 = vmul.f32 %v723_v59, %v719_v58 }
0x1465   :  { %727 = vrot.lane.b32.xlu0 %v725_v60, %s1011_s30 }
0x14d7   :  { %v728_v1 = vpop.permute.xlu0 %727 }
0x14d8   :  { %v730_v61 = vadd.f32 %v728_v1, %v720_v11 }
0x14da   :  { %1005 = vtanh.f32 %v730_v61 }
0x14e7   :  { %v1006_v6 = vpop.eup %1005 }
0x14e8   :  { %733 = vrot.lane.b32.xlu1 %v1006_v6, %s1010_s27 }
0x155a   :  { %v734_v7 = vpop.permute.xlu1 %733 }
0x155b   :  { %v736_v8 = vmul.f32 %v734_v7, %v719_v58 }
0x155d   :  { %742 = vrot.lane.b32.xlu0 %v736_v8, %s1011_s30 }
0x15cf   :  { %v743_v9 = vpop.permute.xlu0 %742 }
0x15d0   :  { %961 = vmatmul.mubr.msk.f32.vlgmr.msra.gmra.mxu0 %vm177_vm2, %v743_v9 }
0x1690   :  { %v812_v13 = vpop.f32.mrf.mxu0 }
0x1691   :  { %v813_v14 = vadd.f32 %v842_v12, %v812_v13 }
0x1692   :  { %v962_v16 = vpop.f32.mrf.mxu0 }
0x1693   :  { %817 = vst.msk [vmem:[%s1249_s4] sm:$0xff] %vm816_vm6, %v813_v14 }

</bundles_post_ra>
